<compile_context>
chip_gen: v7x
topology: tpu7x:2x2x1
jax: 0.10.0
libtpu: 0.0.40
codegen_flags: <defaults>
</compile_context>

<pallas_src>
import functools

import jax
import jax.numpy as jnp
from jax import lax
from jax.experimental import pallas as pl
from jax.experimental.pallas import tpu as pltpu


def _round_up(x: int, m: int) -> int:
    return ((x + m - 1) // m) * m


def _pick_tk(d_pad128: int, tk_max: int) -> int:
    """Largest multiple of 128 <= tk_max that exactly divides d_pad128 (a 128 multiple)."""
    n = d_pad128 // 128
    max_t = max(1, min(tk_max // 128, n))
    best = 1
    for t in range(1, max_t + 1):
        if n % t == 0:
            best = t
    return best * 128


def _linear_kernel(x_ref, w_ref, b_ref, o_ref, *, compute_dtype):
    """General 3-D-grid path: grid = (B tiles, C tiles, K tiles), K last ("arbitrary")."""
    k = pl.program_id(2)

    @pl.when(k == 0)
    def _():
        # Initialize the resident output tile with the bias so the epilogue is a no-op.
        o_ref[...] = jnp.broadcast_to(b_ref[...].astype(o_ref.dtype), o_ref.shape)

    lhs = x_ref[...]
    rhs = w_ref[...]
    if compute_dtype is not None:
        lhs = lhs.astype(compute_dtype)
        rhs = rhs.astype(compute_dtype)

    # x[TM,TK] · weight[TN,TK], contracting dim 1 of both (x @ W.T), f32 MXU accumulation.
    o_ref[...] += lax.dot_general(
        lhs, rhs,
        dimension_numbers=(((1,), (1,)), ((), ())),
        preferred_element_type=jnp.float32,
    ).astype(o_ref.dtype)


def _linear_resident_kernel(x_ref, w_ref, b_ref, o_ref, *, compute_dtype):
    """Weight-resident fast path: whole weight/bias live in VMEM; grid streams B tiles."""
    lhs = x_ref[...]
    rhs = w_ref[...]
    if compute_dtype is not None:
        lhs = lhs.astype(compute_dtype)
        rhs = rhs.astype(compute_dtype)
    acc = lax.dot_general(
        lhs, rhs,
        dimension_numbers=(((1,), (1,)), ((), ())),
        preferred_element_type=jnp.float32,
    )
    o_ref[...] = (acc + b_ref[...]).astype(o_ref.dtype)


@functools.partial(
    jax.jit, static_argnames=("tm", "tn", "tk", "compute_dtype", "force_general"))
def lr_forward(x, weight, bias, *, tm: int = 512, tn: int = 512, tk: int = 1024,
               compute_dtype=None, force_general: bool = False):
    """Forward of LR: out = x @ weight.T + bias (PyTorch nn.Linear semantics).

    x:      [B, D]
    weight: [C, D]  (PyTorch layout; never transposed by the wrapper)
    bias:   [C]
    compute_dtype: optional dtype (e.g. jnp.bfloat16) for the MXU operands; the
        accumulation stays f32. Gate on accuracy budget.
    returns [B, C] float32
    """
    B, D = x.shape
    C = weight.shape[0]
    out_dtype = jnp.float32

    # Only the contraction axis must be zero-padded for correctness (pad to 128 only).
    D_pad = _round_up(D, 128)
    if D_pad != D:
        x = jnp.pad(x, ((0, 0), (0, D_pad - D)))
        weight = jnp.pad(weight, ((0, 0), (0, D_pad - D)))
    bias2d = bias.reshape(1, C)

    TM = min(tm, _round_up(B, 8))

    flops = 2 * B * D * C
    bytes_accessed = (B * D * x.dtype.itemsize + C * D * weight.dtype.itemsize
                      + B * C * 4 + C * 4)

    # ---------------- Weight-resident fast path (LR-style small weights) ----------------
    w_bytes = C * D_pad * weight.dtype.itemsize
    fast_vmem = (2 * w_bytes                       # weight (counted double, conservative)
                 + 2 * TM * D_pad * x.dtype.itemsize   # double-buffered x tiles
                 + 2 * TM * C * 4                  # double-buffered output tiles
                 + C * 4)                          # bias
    if (not force_general) and fast_vmem <= 12 * 1024 * 1024:
        # v7x megacore: split B into >=2 blocks when there is enough work.
        if pl.cdiv(B, TM) < 2 and B >= 512:
            TM = _round_up(pl.cdiv(B, 2), 8)
        grid = (pl.cdiv(B, TM),)
        return pl.pallas_call(
            functools.partial(_linear_resident_kernel, compute_dtype=compute_dtype),
            out_shape=jax.ShapeDtypeStruct((B, C), out_dtype),
            grid_spec=pltpu.PrefetchScalarGridSpec(
                num_scalar_prefetch=0,
                grid=grid,
                in_specs=[
                    pl.BlockSpec((TM, D_pad), lambda i: (i, 0)),   # x tile (streamed)
                    pl.BlockSpec((C, D_pad), lambda i: (0, 0)),    # whole weight, DMA'd once
                    pl.BlockSpec((1, C), lambda i: (0, 0)),        # whole bias, DMA'd once
                ],
                out_specs=pl.BlockSpec((TM, C), lambda i: (i, 0)),
            ),
            compiler_params=pltpu.CompilerParams(
                dimension_semantics=("parallel",)),
            cost_estimate=pl.CostEstimate(
                flops=flops, transcendentals=0, bytes_accessed=bytes_accessed),
        )(x, weight, bias2d)

    # ---------------------------- General tiled 3-D-grid path ---------------------------
    TN = min(tn, _round_up(C, 128))
    TK = _pick_tk(D_pad, tk)

    # v7x megacore: guarantee >=2 blocks across the parallel axes when B is large enough.
    if pl.cdiv(B, TM) * pl.cdiv(C, TN) < 2 and B >= 512:
        TM = _round_up(pl.cdiv(B, 2), 8)

    grid = (pl.cdiv(B, TM), pl.cdiv(C, TN), D_pad // TK)

    # Default tiles (512/512/1024 f32) use ~11 MiB double-buffered VMEM, under the scoped
    # default on v5e/v6e/v7x, so no vmem_limit_bytes override is needed here.
    return pl.pallas_call(
        functools.partial(_linear_kernel, compute_dtype=compute_dtype),
        out_shape=jax.ShapeDtypeStruct((B, C), out_dtype),
        grid_spec=pltpu.PrefetchScalarGridSpec(
            num_scalar_prefetch=0,
            grid=grid,
            in_specs=[
                pl.BlockSpec((TM, TK), lambda i, j, k: (i, k)),   # x tile
                pl.BlockSpec((TN, TK), lambda i, j, k: (j, k)),   # weight tile (un-transposed)
                pl.BlockSpec((1, TN), lambda i, j, k: (0, j)),    # bias tile per C tile
            ],
            out_specs=pl.BlockSpec((TM, TN), lambda i, j, k: (i, j)),
        ),
        compiler_params=pltpu.CompilerParams(
            dimension_semantics=("parallel", "parallel", "arbitrary")),
        cost_estimate=pl.CostEstimate(
            flops=flops, transcendentals=0, bytes_accessed=bytes_accessed),
    )(x, weight, bias2d)


if __name__ == "__main__":
    # Small shapes implied by the module: x is [batch, input_size].
    batch = 8
    input_size = 32
    num_classes = 16

    key = jax.random.PRNGKey(0)
    kx, kw, kb = jax.random.split(key, 3)

    x = jax.random.normal(kx, (batch, input_size), dtype=jnp.float32)
    # Deterministic parameter init (mimics nn.Linear's uniform(-1/sqrt(D), 1/sqrt(D))).
    bound = 1.0 / (input_size ** 0.5)
    weight = jax.random.uniform(
        kw, (num_classes, input_size), minval=-bound, maxval=bound, dtype=jnp.float32)
    bias = jax.random.uniform(
        kb, (num_classes,), minval=-bound, maxval=bound, dtype=jnp.float32)

    ref = jnp.dot(x, weight.T, precision=lax.Precision.HIGHEST) + bias

    # 1) f32, weight-resident fast path (the shapes the module implies).
    out = lr_forward(x, weight, bias)
    jax.block_until_ready(out)
    assert out.shape == (batch, num_classes)
    assert jnp.allclose(out, ref, atol=1e-5, rtol=1e-5)

    # 2) bf16 MXU operands with f32 accumulation (looser tolerance, per accuracy budget).
    out_bf16 = lr_forward(x, weight, bias, compute_dtype=jnp.bfloat16)
    jax.block_until_ready(out_bf16)
    assert jnp.allclose(out_bf16, ref, atol=3e-2, rtol=3e-2)

    # 3) General tiled path coverage: non-aligned B/C/D, multi-step K loop, edge masking.
    B2, D2, C2 = 300, 300, 70
    x2 = jax.random.normal(kx, (B2, D2), dtype=jnp.float32)
    w2 = jax.random.normal(kw, (C2, D2), dtype=jnp.float32) * 0.05
    b2 = jax.random.normal(kb, (C2,), dtype=jnp.float32)
    ref2 = jnp.dot(x2, w2.T, precision=lax.Precision.HIGHEST) + b2
    out2 = lr_forward(x2, w2, b2, tm=128, tn=128, tk=128, force_general=True)
    jax.block_until_ready(out2)
    assert out2.shape == (B2, C2)
    assert jnp.allclose(out2, ref2, atol=1e-3, rtol=1e-3)

    print("KERNEL_OK")
</pallas_src>

<mosaic_0001>
module attributes {stable_mosaic.version = 11 : i64} {
  func.func @_linear_resident_kernel(%arg0: i32, %arg1: memref<8x128xf32, #tpu.memory_space<vmem>>, %arg2: memref<16x128xf32, #tpu.memory_space<vmem>>, %arg3: memref<1x16xf32, #tpu.memory_space<vmem>>, %arg4: memref<8x16xf32, #tpu.memory_space<vmem>>) attributes {dimension_semantics = [#tpu.dimension_semantics<parallel>], iteration_bounds = array<i64: 1>, scalar_prefetch = 0 : i64, scratch_operands = 0 : i64, tpu.core_type = #tpu.core_type<tc>, window_params = [{transform_indices = @transform_0, window_bounds = array<i64: 8, 128>}, {pipeline_mode = #tpu.pipeline_mode<synchronous>, transform_indices = @transform_1, window_bounds = array<i64: 16, 128>}, {pipeline_mode = #tpu.pipeline_mode<synchronous>, transform_indices = @transform_2, window_bounds = array<i64: 1, 16>}, {transform_indices = @transform_3, window_bounds = array<i64: 8, 16>}]} {
    %c0 = arith.constant 0 : index
    %c0_0 = arith.constant 0 : index
    %0 = vector.load %arg1[%c0, %c0_0] : memref<8x128xf32, #tpu.memory_space<vmem>>, vector<8x128xf32>
    %c0_1 = arith.constant 0 : index
    %c0_2 = arith.constant 0 : index
    %1 = vector.load %arg2[%c0_1, %c0_2] : memref<16x128xf32, #tpu.memory_space<vmem>>, vector<16x128xf32>
    %cst = arith.constant dense<0.000000e+00> : vector<8x16xf32>
    %2 = tpu.matmul %0, %1, %cst {dimension_numbers = #tpu.dot_dimension_numbers<[1], [1], [0], [0], [0, 0, 1, 0], [], []>} : vector<8x128xf32>, vector<16x128xf32>, vector<8x16xf32> -> vector<8x16xf32>
    %c0_3 = arith.constant 0 : index
    %c0_4 = arith.constant 0 : index
    %3 = vector.load %arg3[%c0_3, %c0_4] : memref<1x16xf32, #tpu.memory_space<vmem>>, vector<1x16xf32>
    %4 = vector.broadcast %3 : vector<1x16xf32> to vector<8x16xf32>
    %5 = arith.addf %2, %4 : vector<8x16xf32>
    %c0_5 = arith.constant 0 : index
    %c0_6 = arith.constant 0 : index
    %6 = vector.load %arg4[%c0_5, %c0_6] : memref<8x16xf32, #tpu.memory_space<vmem>>, vector<8x16xf32>
    tpu.vector_store %arg4[%c0_5, %c0_6], %5 {strides = array<i32>} : memref<8x16xf32, #tpu.memory_space<vmem>>, vector<8x16xf32>,
    return
  }
  func.func @transform_0(%arg0: i32) -> (i32, i32) {
    %c0_i32 = arith.constant 0 : i32
    %c0_i32_0 = arith.constant 0 : i32
    return %arg0, %c0_i32 : i32, i32
  }
  func.func @transform_1(%arg0: i32) -> (i32, i32) {
    %c0_i32 = arith.constant 0 : i32
    %c0_i32_0 = arith.constant 0 : i32
    %c0_i32_1 = arith.constant 0 : i32
    return %c0_i32, %c0_i32_0 : i32, i32
  }
  func.func @transform_2(%arg0: i32) -> (i32, i32) {
    %c0_i32 = arith.constant 0 : i32
    %c0_i32_0 = arith.constant 0 : i32
    %c0_i32_1 = arith.constant 0 : i32
    return %c0_i32, %c0_i32_0 : i32, i32
  }
  func.func @transform_3(%arg0: i32) -> (i32, i32) {
    %c0_i32 = arith.constant 0 : i32
    %c0_i32_0 = arith.constant 0 : i32
    return %arg0, %c0_i32 : i32, i32
  }
}

</mosaic_0001>

<bundles_post_ra>
// kernel: lr_forward.1
= control target key start
LH: loop header
LB: loop body
LE: loop exit
PB: predicated region body
PF: predicated region fallthrough
CT: control target
= control target key end

     0   :  { %v153_v2 = vmov 0.0|0.0   ;;  %vm154_vm0 = vmmov 0   ;;  %v155_v4 = vmov 0.0   ;;  %s201_s0 = inlined_call_operand.vmem [shape: f32[8,128], index: 0, kind: input, shape index: {}]   ;;  %s202_s1 = inlined_call_operand.vmem [shape: f32[16,128], index: 1, kind: input, shape index: {}]   ;;  %s203_s2 = inlined_call_operand.vmem [shape: f32[1,16], index: 2, kind: input, shape index: {}]   ;;  %s204_s3 = inlined_call_operand.hbm [shape: f32[8,16], index: 3, kind: output, shape index: {}]  }
   0x1   :  { %v16_v0 = vld [vmem:[%s202_s1] sm:$0xff]  ;;  %v17_v1 = vld [vmem:[%s202_s1 + $0x8] sm:$0xff]  ;;  %122 = vmatprep.subr.bf16.mxu0 %v153_v2  ;;  %119 = vmatprep.mubr.msk.f32.mxu0 %vm154_vm0, %v155_v4 }
   0x2   :  { %v123_v3 = vpack.c.bf16 %v17_v1, %v16_v0 }
   0x3   :  { %8 = vsyncpa [#allocation3], 0  ;;  %v15_v5 = vld [vmem:[%s201_s0] sm:$0xff]  ;;  %s156_s20 = smov [#allocation2]   ;;  %vm95_vm1 = vcmask 130048  }
   0x4   :  { %124 = vmatpush3.bf16.xpose.msra.mxu0 %v123_v3  ;;  %v111_v6 = vld [vmem:[%s203_s2] ss:$0 sm:$0xff]  ;;  %s103_s21 = sshll.u32 %s156_s20, 4  ;;  %s104_s21 = int_to_ptr.vmem [resolvable:$true] %s103_s21 }
   0x5   :  { %s129_s1 = scalar_lea.vmem %s104_s21, 128  ;;  %p134_p1 = scmp.lt.s32.totalorder %s104_s21, %s104_s21 }
   0x6   :  { %p130_p0 = scmp.ne.s32.totalorder %s104_s21, %s129_s1  ;;  %p135_p2 = scmp.lt.s32.totalorder %s129_s1, %s129_s1 }
   0x8   :  { %p136_p3 = por %p135_p2, %p134_p1 }
   0xa   :  { %p137_p4 = pnand %p136_p3, %p130_p0 }
   0xb   :  { %120 = vmatmul.mubr.f32.vlgmr.msra.gmra.mrb[0].mxu0 %v15_v5 }
  0xde   :  { %v91_v7 = vpop.f32.mrb[0].mxu0 }
  0xdf   :  { %v92_v8 = vadd.f32 %v111_v6, %v91_v7  ;;  %v121_v9 = vpop.f32.mrb[1].mxu0 }
  0xe1   :  { %96 = vst.msk [vmem:[#allocation2] sm:$0xff] %vm95_vm1, %v92_v8 }
  0xe2   :  { %140 = shalt.err (!%p137_p4)
}
  0xe3   :  { %s141_s23 = scalar_lea.hbm %s204_s3, 128 }
  0xe4   :  { %p142_p5 = scmp.ne.s32.totalorder %s204_s3, %s141_s23  ;;  %p145_p6 = scmp.lt.u32.totalorder %s141_s23, %s204_s3 }
  0xe6   :  { %p147_p7 = pnand %p145_p6, %p142_p5 }
  0xe8   :  { %150 = shalt.err (!%p147_p7)
}
  0xe9   :  { %106 = dma.vmem_to_hbm [thread:$0]  %s104_s21, 128, %s204_s3, [#allocation3]  }
  0xea   :  { %151 = dma.done.wait [#allocation3], 128  }
  0xeb   :  { %152 = vsyncadd [#allocation3], 4294967168 }
  0xec   :  { %110 = vsyncpa [#allocation3], 1 }

</bundles_post_ra>
